<compile_context>
chip_gen: v5e
topology: v5e:2x2
jax: 0.10.0
libtpu: 0.0.40
codegen_flags: <defaults>
</compile_context>

<pallas_src>
import jax
import jax.numpy as jnp
from jax.experimental import pallas as pl
from jax.experimental.pallas import tpu as pltpu


# Above this lane-padded weight size, use the separable two-matmul path.
_FUSED_WEIGHT_VMEM_LIMIT = 2 * 1024 * 1024


def _cdiv(a: int, b: int) -> int:
    return -(-a // b)


def _round_up(v: int, m: int) -> int:
    return _cdiv(v, m) * m


def _vmem_capacity_bytes() -> int:
    """Physical VMEM per TensorCore (generation aware); conservative fallback."""
    default = 64 * 1024 * 1024  # v7x per-core VMEM (smallest of v5e/v6e/v7x)
    try:
        info = pltpu.get_tpu_info()
        return int(getattr(info, "vmem_capacity_bytes", default))
    except Exception:
        return default


def _area_matrix(in_size: int, out_size: int) -> jnp.ndarray:
    """Averaging matrix R (out, in): R @ v = 1-D adaptive area pool of v (f32)."""
    i = jnp.arange(out_size)
    start = (i * in_size) // out_size                     # floor
    end = ((i + 1) * in_size + out_size - 1) // out_size  # ceil
    h = jnp.arange(in_size)
    mask = (h[None, :] >= start[:, None]) & (h[None, :] < end[:, None])
    counts = (end - start).astype(jnp.float32)
    return mask.astype(jnp.float32) / counts[:, None]


def _matmul_kernel(x_ref, w_ref, o_ref):
    # x_ref: (blk, K) input dtype; w_ref: (K, N) weight (constant index map,
    # stays resident across grid steps); o_ref: (blk, N) lane-dense output slab.
    o_ref[...] = jnp.dot(
        x_ref[...], w_ref[...], preferred_element_type=jnp.float32
    ).astype(o_ref.dtype)


def _pick_block(m: int, x_row_bytes: int, o_row_bytes: int,
                wt_vmem_bytes: int, sublane: int, vmem_cap: int) -> int:
    """Rows per grid step from lane-padded VMEM accounting (generation aware)."""
    # Budget for all pipeline buffers, leaving headroom for Mosaic internal
    # scratch: v5e/v6e (128 MiB VMEM) -> 48 MiB, v7x (64 MiB) -> ~35 MiB.
    budget = min(int(vmem_cap * 0.55), 48 * 1024 * 1024)
    per_row = 2 * (x_row_bytes + o_row_bytes)       # double-buffered x and out tiles
    avail = max(budget - wt_vmem_bytes, per_row * sublane)
    b = avail // per_row
    # Mem-bound kernel: the HBM roofline saturates well below ~8 MiB of (x+out)
    # tile per step; bigger tiles only add VMEM pressure.
    b = min(b, max((16 * 1024 * 1024) // per_row, sublane))
    b = min(b, _round_up(m, sublane))
    b = max((b // sublane) * sublane, sublane)
    # Prefer a handful of grid steps (software pipelining everywhere, 2-TC
    # sharding on v7x), but never shrink below the ~512-row roofline plateau and
    # never split problems that already fit a single modest block (splitting
    # tiny work is pure overhead on single-TC v5e/v6e).
    min_rows = max(512, sublane)
    while b > min_rows and _cdiv(m, b) < 4:
        b = max(((b // 2) // sublane) * sublane, sublane)
    return b


def _rowblock_matmul(x2d: jnp.ndarray, wt: jnp.ndarray) -> jnp.ndarray:
    """out = x2d @ wt via a row-blocked Pallas matmul (wt resident every step)."""
    m, k = x2d.shape
    n = wt.shape[1]
    x_it = jnp.dtype(x2d.dtype).itemsize
    w_it = jnp.dtype(wt.dtype).itemsize
    o_it = x_it                                      # output keeps the input dtype

    # Lane-padded VMEM footprints (tiles pad the minor dim to 128 lanes); output
    # rows counted at >= f32 width to cover the pre-cast accumulator.
    x_row_bytes = _round_up(k, 128) * x_it
    o_row_bytes = _round_up(n, 128) * max(o_it, 4)
    wt_vmem = _round_up(k, 8) * _round_up(n, 128) * w_it * 2   # both pipeline buffers

    sublane = max(8, 32 // x_it)                     # 8 for f32, 16 for bf16/f16
    vmem_cap = _vmem_capacity_bytes()
    blk = _pick_block(m, x_row_bytes, o_row_bytes, wt_vmem, sublane, vmem_cap)

    # Rebalance: keep the same number of steps, minimize zero-padded rows.
    steps = _cdiv(m, blk)
    blk = _round_up(_cdiv(m, steps), sublane)
    m_pad = steps * blk
    if m_pad != m:
        x2d = jnp.pad(x2d, ((0, m_pad - m), (0, 0)))

    vmem_need = 2 * blk * (x_row_bytes + o_row_bytes) + wt_vmem
    vmem_limit = int(min(vmem_cap - (8 << 20),
                         max(vmem_need + (8 << 20), 32 << 20)))

    cost = pl.CostEstimate(
        flops=2 * m_pad * k * n,
        transcendentals=0,
        bytes_accessed=m_pad * k * x_it + m_pad * n * o_it + k * n * w_it,
    )

    out = pl.pallas_call(
        _matmul_kernel,
        out_shape=jax.ShapeDtypeStruct((m_pad, n), x2d.dtype),
        grid_spec=pltpu.PrefetchScalarGridSpec(
            num_scalar_prefetch=0,
            grid=(steps,),
            in_specs=[
                pl.BlockSpec((blk, k), lambda b: (b, 0)),
                pl.BlockSpec((k, n), lambda b: (0, 0)),   # constant -> not re-fetched
            ],
            out_specs=pl.BlockSpec((blk, n), lambda b: (b, 0)),
        ),
        compiler_params=pltpu.CompilerParams(
            dimension_semantics=("parallel",),
            vmem_limit_bytes=vmem_limit,
        ),
        cost_estimate=cost,
    )(x2d, wt)

    return out if m_pad == m else out[:m]


def interpolation_layer(x: jnp.ndarray, size, *, separable=None) -> jnp.ndarray:
    """Equivalent of torch.nn.functional.interpolate(x, size=size, mode='area').

    x: (N, C, Hin, Win) float array. Returns (N, C, Hout, Wout) in x.dtype.
    """
    if isinstance(size, int):
        size = (size, size)
    n, c, h_in, w_in = x.shape
    h_out, w_out = size
    nc = n * c
    hw_in, hw_out = h_in * w_in, h_out * w_out

    x_dt = jnp.dtype(x.dtype)
    # bf16 inputs -> bf16 averaging weights (full-rate MXU path, half the weight
    # bytes); accumulation stays f32 inside the kernel.
    wt_dtype = jnp.bfloat16 if x_dt == jnp.dtype(jnp.bfloat16) else jnp.float32
    wt_it = jnp.dtype(wt_dtype).itemsize

    rh = _area_matrix(h_in, h_out)                   # (Hout, Hin) f32
    rw = _area_matrix(w_in, w_out)                   # (Wout, Win) f32

    if separable is None:
        fused_wt_vmem = _round_up(hw_in, 8) * _round_up(hw_out, 128) * wt_it
        separable = fused_wt_vmem > _FUSED_WEIGHT_VMEM_LIMIT

    if not separable:
        # One fused MXU matmul, single HBM pass over x.
        kt = jnp.kron(rh, rw).T.astype(wt_dtype)     # (Hin*Win, Hout*Wout)
        out2d = _rowblock_matmul(x.reshape(nc, hw_in), kt)
        return out2d.reshape(n, c, h_out, w_out)

    # Separable path: out = Rh @ X @ Rw^T per plane as two row-blocked matmuls.
    # Contraction is always on the minor (lane) dim; the transposes touch only
    # the small intermediate and run as plain XLA ops in the wrapper.
    y = _rowblock_matmul(x.reshape(nc * h_in, w_in), rw.T.astype(wt_dtype))  # (NC*Hin, Wout)
    y = y.reshape(nc, h_in, w_out).transpose(0, 2, 1).reshape(nc * w_out, h_in)
    z = _rowblock_matmul(y, rh.T.astype(wt_dtype))                           # (NC*Wout, Hout)
    return z.reshape(nc, w_out, h_out).transpose(0, 2, 1).reshape(n, c, h_out, w_out)


if __name__ == "__main__":
    key = jax.random.PRNGKey(0)
    # Small NCHW input; target size deliberately non-divisible to exercise the
    # general adaptive (area) pooling path.
    N, C, H, W = 2, 4, 16, 16
    size = (7, 5)

    x = jax.random.normal(key, (N, C, H, W), dtype=jnp.float32)

    out = interpolation_layer(x, size)
    out = jax.block_until_ready(out)

    # Pure-JAX reference (separable averaging-matrix formulation).
    rh = _area_matrix(H, size[0])
    rw = _area_matrix(W, size[1])
    ref = jnp.einsum("oh,nchw,pw->ncop", rh, x, rw)

    assert out.shape == (N, C, size[0], size[1])
    assert out.dtype == x.dtype
    assert jnp.allclose(out, ref, atol=2e-5, rtol=2e-5)

    # Exercise the separable (two-matmul) path used for large spatial sizes.
    out_sep = jax.block_until_ready(interpolation_layer(x, size, separable=True))
    assert out_sep.shape == (N, C, size[0], size[1])
    assert jnp.allclose(out_sep, ref, atol=1e-4, rtol=1e-4)

    # bf16 input path (bf16 weights, f32 accumulation in-kernel).
    xb = x.astype(jnp.bfloat16)
    out_b = jax.block_until_ready(interpolation_layer(xb, size))
    assert out_b.dtype == jnp.bfloat16
    assert jnp.allclose(out_b.astype(jnp.float32), ref, atol=3e-2, rtol=3e-2)

    print("KERNEL_OK")
</pallas_src>

<mosaic_0001>
module attributes {stable_mosaic.version = 11 : i64} {
  func.func @_matmul_kernel(%arg0: i32, %arg1: memref<8x256xf32, #tpu.memory_space<vmem>>, %arg2: memref<256x35xf32, #tpu.memory_space<vmem>>, %arg3: memref<8x35xf32, #tpu.memory_space<vmem>>) attributes {dimension_semantics = [#tpu.dimension_semantics<parallel>], iteration_bounds = array<i64: 1>, scalar_prefetch = 0 : i64, scratch_operands = 0 : i64, tpu.core_type = #tpu.core_type<tc>, window_params = [{transform_indices = @transform_0, window_bounds = array<i64: 8, 256>}, {pipeline_mode = #tpu.pipeline_mode<synchronous>, transform_indices = @transform_1, window_bounds = array<i64: 256, 35>}, {transform_indices = @transform_2, window_bounds = array<i64: 8, 35>}]} {
    %c0 = arith.constant 0 : index
    %c0_0 = arith.constant 0 : index
    %0 = vector.load %arg1[%c0, %c0_0] : memref<8x256xf32, #tpu.memory_space<vmem>>, vector<8x256xf32>
    %c0_1 = arith.constant 0 : index
    %c0_2 = arith.constant 0 : index
    %1 = vector.load %arg2[%c0_1, %c0_2] : memref<256x35xf32, #tpu.memory_space<vmem>>, vector<256x35xf32>
    %cst = arith.constant dense<0.000000e+00> : vector<8x35xf32>
    %2 = tpu.matmul %0, %1, %cst {dimension_numbers = #tpu.dot_dimension_numbers<[1], [0], [0], [1], [0, 0, 1, 1], [], []>} : vector<8x256xf32>, vector<256x35xf32>, vector<8x35xf32> -> vector<8x35xf32>
    %c0_3 = arith.constant 0 : index
    %c0_4 = arith.constant 0 : index
    %3 = vector.load %arg3[%c0_3, %c0_4] : memref<8x35xf32, #tpu.memory_space<vmem>>, vector<8x35xf32>
    tpu.vector_store %arg3[%c0_3, %c0_4], %2 {strides = array<i32>} : memref<8x35xf32, #tpu.memory_space<vmem>>, vector<8x35xf32>,
    return
  }
  func.func @transform_0(%arg0: i32) -> (i32, i32) {
    %c0_i32 = arith.constant 0 : i32
    %c0_i32_0 = arith.constant 0 : i32
    return %arg0, %c0_i32 : i32, i32
  }
  func.func @transform_1(%arg0: i32) -> (i32, i32) {
    %c0_i32 = arith.constant 0 : i32
    %c0_i32_0 = arith.constant 0 : i32
    %c0_i32_1 = arith.constant 0 : i32
    return %c0_i32, %c0_i32_0 : i32, i32
  }
  func.func @transform_2(%arg0: i32) -> (i32, i32) {
    %c0_i32 = arith.constant 0 : i32
    %c0_i32_0 = arith.constant 0 : i32
    return %arg0, %c0_i32 : i32, i32
  }
}

</mosaic_0001>

<bundles_post_ra>
// kernel: tpu_custom_call.1
= control target key start
LH: loop header
LB: loop body
LE: loop exit
PB: predicated region body
PF: predicated region fallthrough
CT: control target
= control target key end

     0   :  { %s252_s0 = inlined_call_operand.vmem [shape: f32[8,256], index: 0, kind: input, shape index: {}]   ;;  %s253_s1 = inlined_call_operand.vmem [shape: f32[256,35], index: 1, kind: input, shape index: {}]   ;;  %s254_s2 = inlined_call_operand.hbm [shape: f32[8,35], index: 2, kind: output, shape index: {}]  }
   0x1   :  { %v29_v0 = vld [vmem:[%s253_s1 + $0x78] sm:$0xff]  ;;  %v28_v2 = vld [vmem:[%s253_s1 + $0x70] sm:$0xff]  ;;  %v27_v4 = vld [vmem:[%s253_s1 + $0x68] sm:$0xff] }
   0x2   :  { %v45_v1 = vld [vmem:[%s253_s1 + $0xf8] sm:$0xff]  ;;  %46 = vmatpush.msra.mxu0 %v29_v0  ;;  %v44_v3 = vld [vmem:[%s253_s1 + $0xf0] sm:$0xff]  ;;  %v43_v5 = vld [vmem:[%s253_s1 + $0xe8] sm:$0xff] }
   0x3   :  { %66 = vmatpush.msra.mxu1 %v45_v1  ;;  %v26_v6 = vld [vmem:[%s253_s1 + $0x60] sm:$0xff]  ;;  %v25_v8 = vld [vmem:[%s253_s1 + $0x58] sm:$0xff]  ;;  %v24_v10 = vld [vmem:[%s253_s1 + $0x50] sm:$0xff] }
   0x4   :  { %47 = vmatpush.msra.mxu0 %v28_v2  ;;  %v42_v7 = vld [vmem:[%s253_s1 + $0xe0] sm:$0xff]  ;;  %v41_v9 = vld [vmem:[%s253_s1 + $0xd8] sm:$0xff]  ;;  %v40_v11 = vld [vmem:[%s253_s1 + $0xd0] sm:$0xff] }
   0x5   :  { %67 = vmatpush.msra.mxu1 %v44_v3  ;;  %v23_v12 = vld [vmem:[%s253_s1 + $0x48] sm:$0xff] }
   0x6   :  { %48 = vmatpush.msra.mxu0 %v27_v4  ;;  %v39_v13 = vld [vmem:[%s253_s1 + $0xc8] sm:$0xff] }
   0x7   :  { %68 = vmatpush.msra.mxu1 %v43_v5 }
   0x8   :  { %49 = vmatpush.msra.mxu0 %v26_v6 }
   0x9   :  { %69 = vmatpush.msra.mxu1 %v42_v7 }
   0xa   :  { %50 = vmatpush.msra.mxu0 %v25_v8 }
   0xb   :  { %70 = vmatpush.msra.mxu1 %v41_v9 }
   0xc   :  { %51 = vmatpush.msra.mxu0 %v24_v10 }
   0xd   :  { %71 = vmatpush.msra.mxu1 %v40_v11 }
   0xe   :  { %7 = vsyncpa [#allocation3], 0  ;;  %v22_v14 = vld [vmem:[%s253_s1 + $0x40] sm:$0xff]  ;;  %52 = vmatpush.msra.mxu0 %v23_v12  ;;  %v21_v16 = vld [vmem:[%s253_s1 + $0x38] sm:$0xff]  ;;  %s131_s21 = smov [#allocation2]   ;;  %vm86_vm0 = vcmask 285696  }
   0xf   :  { %v38_v15 = vld [vmem:[%s253_s1 + $0xc0] sm:$0xff]  ;;  %72 = vmatpush.msra.mxu1 %v39_v13  ;;  %v37_v17 = vld [vmem:[%s253_s1 + $0xb8] sm:$0xff]  ;;  %v20_v18 = vld [vmem:[%s253_s1 + $0x30] sm:$0xff]  ;;  %s93_s22 = sshll.u32 %s131_s21, 4  ;;  %s94_s22 = int_to_ptr.vmem [resolvable:$true] %s93_s22 }
  0x10   :  { %53 = vmatpush.msra.mxu0 %v22_v14  ;;  %v36_v19 = vld [vmem:[%s253_s1 + $0xb0] sm:$0xff]  ;;  %v19_v20 = vld [vmem:[%s253_s1 + $0x28] sm:$0xff]  ;;  %v18_v22 = vld [vmem:[%s253_s1 + $0x20] sm:$0xff] }
  0x11   :  { %73 = vmatpush.msra.mxu1 %v38_v15  ;;  %v35_v21 = vld [vmem:[%s253_s1 + $0xa8] sm:$0xff]  ;;  %v34_v23 = vld [vmem:[%s253_s1 + $0xa0] sm:$0xff]  ;;  %v17_v24 = vld [vmem:[%s253_s1 + $0x18] sm:$0xff] }
  0x12   :  { %54 = vmatpush.msra.mxu0 %v21_v16  ;;  %v33_v25 = vld [vmem:[%s253_s1 + $0x98] sm:$0xff]  ;;  %v16_v26 = vld [vmem:[%s253_s1 + $0x10] sm:$0xff]  ;;  %v15_v28 = vld [vmem:[%s253_s1 + $0x8] sm:$0xff] }
  0x13   :  { %74 = vmatpush.msra.mxu1 %v37_v17  ;;  %v32_v27 = vld [vmem:[%s253_s1 + $0x90] sm:$0xff]  ;;  %v31_v29 = vld [vmem:[%s253_s1 + $0x88] sm:$0xff]  ;;  %v14_v30 = vld [vmem:[%s253_s1] sm:$0xff] }
  0x14   :  { %55 = vmatpush.msra.mxu0 %v20_v18  ;;  %v30_v31 = vld [vmem:[%s253_s1 + $0x80] sm:$0xff]  ;;  %v13_v33 = vld [vmem:[%s252_s0 + $0x8] sm:$0xff]  ;;  %s95_s1 = sshll.u32 %s254_s2, 4  ;;  %s96_s1 = int_to_ptr.hbm [resolvable:$true] %s95_s1 }
  0x15   :  { %75 = vmatpush.msra.mxu1 %v36_v19  ;;  %v12_v32 = vld [vmem:[%s252_s0] sm:$0xff] }
  0x16   :  { %56 = vmatpush.msra.mxu0 %v19_v20 }
  0x17   :  { %76 = vmatpush.msra.mxu1 %v35_v21 }
  0x18   :  { %57 = vmatpush.msra.mxu0 %v18_v22 }
  0x19   :  { %77 = vmatpush.msra.mxu1 %v34_v23 }
  0x1a   :  { %58 = vmatpush.msra.mxu0 %v17_v24 }
  0x1b   :  { %78 = vmatpush.msra.mxu1 %v33_v25 }
  0x1c   :  { %59 = vmatpush.msra.mxu0 %v16_v26 }
  0x1d   :  { %79 = vmatpush.msra.mxu1 %v32_v27 }
  0x1e   :  { %60 = vmatpush.msra.mxu0 %v15_v28 }
  0x1f   :  { %80 = vmatpush.msra.mxu1 %v31_v29 }
  0x20   :  { %61 = vmatpush.msra.mxu0 %v14_v30 }
  0x21   :  { %81 = vmatpush.msra.mxu1 %v30_v31  ;;  %62 = vmatmul.f32.vlgmr.msra.gmra.mxu0 %v12_v32 }
  0x22   :  { %82 = vmatmul.f32.vlgmr.msra.gmra.mxu1 %v13_v33 }
  0x9e   :  { %v63_v34 = vpop.f32.mrf.mxu0 }
  0x9f   :  { %v83_v35 = vpop.f32.mrf.mxu1 }
  0xa0   :  { %v84_v36 = vadd.f32 %v83_v35, %v63_v34 }
  0xa2   :  { %87 = vst.msk [vmem:[#allocation2] sm:$0xff] %vm86_vm0, %v84_v36 }
  0xa3   :  { %98 = dma.vmem_to_hbm [thread:$0]  %s94_s22, 128, %s96_s1, [#allocation3]  }
  0xa4   :  { %129 = dma.done.wait [#allocation3], 128  }
  0xa5   :  { %130 = vsyncadd [#allocation3], 4294967168 }
  0xa6   :  { %103 = vsyncpa [#allocation3], 1 }

</bundles_post_ra>
